<compile_context>
chip_gen: v7x
topology: tpu7x:2x2x1
jax: 0.10.0
libtpu: 0.0.40
codegen_flags: <defaults>
</compile_context>

<pallas_src>
import functools
import math

import jax
import jax.numpy as jnp
from jax.experimental import pallas as pl
from jax.experimental.pallas import tpu as pltpu


# --------------------------------------------------------------------------
# Generation-aware tuning helpers
# --------------------------------------------------------------------------

@functools.lru_cache(maxsize=None)
def _vmem_limit_bytes():
    """~80% of this generation's VMEM (v5e/v6e: 128 MiB, v7x: 64 MiB per TC)."""
    try:
        cap = int(pltpu.get_tpu_info().vmem_capacity_bytes)
        if 16 * 1024 * 1024 <= cap <= 256 * 1024 * 1024:
            return int(cap * 0.8)
    except Exception:
        pass
    return 64 * 1024 * 1024


@functools.lru_cache(maxsize=None)
def _buffered_one_supported():
    """Probe pipeline_mode=pl.Buffered(1) (single-buffered resident weights)."""
    try:
        def probe(x_ref, o_ref):
            o_ref[...] = x_ref[...] * 2.0

        x = jnp.ones((8, 128), jnp.float32)
        out = pl.pallas_call(
            probe,
            out_shape=jax.ShapeDtypeStruct((16, 128), jnp.float32),
            grid=(2,),
            in_specs=[pl.BlockSpec((8, 128), lambda i: (0, 0),
                                   pipeline_mode=pl.Buffered(1))],
            out_specs=pl.BlockSpec((8, 128), lambda i: (i, 0)),
        )(x)
        jax.block_until_ready(out)
        return True
    except Exception:
        return False


def _const_spec(arr):
    """Full-array block with a constant index map (resident across the grid).
    Single-buffered when supported: the block index never changes, so a second
    buffer is pure VMEM waste (halves weight footprint -- critical on v7x)."""
    zeros = (0,) * arr.ndim
    index_map = lambda *_, _z=zeros: _z
    if _buffered_one_supported():
        return pl.BlockSpec(arr.shape, index_map, pipeline_mode=pl.Buffered(1))
    return pl.BlockSpec(arr.shape, index_map)


def _pick_k_tile(hidden, max_tile=512):
    """FFN hidden-dim (4*D) streaming chunk: multiples of 256 when possible
    (v6e/v7x MXU is 2x256x256), else 128, else the full axis."""
    for base in (256, 128):
        if hidden % base == 0:
            t = (min(max_tile, hidden) // base) * base
            while t >= base:
                if hidden % t == 0:
                    return t
                t -= base
    return hidden


def _pick_row_tile(rows, d_model, k_tile, vmem_limit, max_tile=2048):
    """Budget-driven row tile: largest multiple of 8 dividing `rows` whose
    activations + scratch fit the per-generation VMEM budget next to the
    resident weights, preferring >=2 grid steps (keeps both v7x TCs busy)."""
    if rows % 8 != 0:
        # TODO(synk): pad ragged row counts to a multiple of 8 instead of
        # falling back to a single full block.
        return rows
    # bf16 resident weights: wqkv (D x 3D) and wo (D x D) + streamed w1/w2 blocks
    resident = 6 * d_model * d_model + 2 * d_model * d_model + 8 * d_model * k_tile
    budget = max(vmem_limit - resident, 1 << 20)
    # per-row bytes: att bf16 + x f32 + out f32 (double-buffered) + 2 f32
    # scratch rows + the (row, k_tile) f32 FFN intermediate.
    per_row = d_model * (2 * 2 + 4 * 2 + 4 * 2 + 4 + 4) + k_tile * 4
    cap = max(8, min(max_tile, budget // per_row))
    cap = (cap // 8) * 8
    tile = rows
    t = (min(cap, rows) // 8) * 8
    while t >= 8:
        if rows % t == 0:
            tile = t
            break
        t -= 8
    if tile == rows and rows % 16 == 0 and rows // 2 <= cap:
        tile = rows // 2            # force >=2 grid steps for megacore sharding
    return tile


def _pick_q_tile(s2, n_heads, hd, vmem_limit, max_tile=512):
    """Query-block tile for attention: bounds the live (H, qt, S2) f32 score
    block instead of materializing the full O(H*S2^2) energy per batch."""
    if s2 % 8 != 0:
        return s2
    budget = max(vmem_limit // 3, 1 << 20)
    per_q_row = n_heads * (6 * s2 + 12 * hd)   # energy f32 + probs bf16 + q/att
    cap = max(8, min(max_tile, budget // max(per_q_row, 1)))
    cap = (cap // 8) * 8
    t = (min(cap, s2) // 8) * 8
    while t >= 8:
        if s2 % t == 0:
            return t
        t -= 8
    return s2


# --------------------------------------------------------------------------
# Kernels
# --------------------------------------------------------------------------

def _qkv_kernel(x_ref, w_ref, qkv_ref):
    # x_ref: (tile, D) f32; w_ref: (D, 3D) bf16 fused Wq|Wk|Wv (one MXU pass,
    # resident across row tiles); qkv_ref: (tile, 3D) bf16 lane-dense store.
    xb = x_ref[...].astype(jnp.bfloat16)
    qkv_ref[...] = jnp.dot(xb, w_ref[...],
                           preferred_element_type=jnp.float32).astype(jnp.bfloat16)


def _attention_kernel(q_ref, k_ref, v_ref, o_ref, *, scale):
    # q/o: (1, H, qt, hd) bf16; k/v: (1, H, S2, hd) bf16; grid = (B, Q_tiles).
    # All heads batched in one einsum; each q-block does a full (exact) softmax
    # over the whole key axis, so no online-softmax state is needed.
    q = q_ref[0]
    k = k_ref[0]
    v = v_ref[0]
    energy = jnp.einsum('hqd,hkd->hqk', q, k,
                        preferred_element_type=jnp.float32) * scale
    energy = energy - jnp.max(energy, axis=-1, keepdims=True)
    p = jnp.exp(energy)                                        # f32 softmax math
    p = p * pl.reciprocal(jnp.sum(p, axis=-1, keepdims=True), approx=True)
    att = jnp.einsum('hqk,hkd->hqd', p.astype(jnp.bfloat16), v,
                     preferred_element_type=jnp.float32)
    o_ref[0] = att.astype(jnp.bfloat16)


def _post_attn_ffn_kernel(att_ref, x_ref, wo_ref, g1_ref, be1_ref,
                          w1_ref, b1_ref, w2_ref, b2_ref, g2_ref, be2_ref,
                          o_ref, y_sc, acc_sc):
    # Fused: attention_linear + residual(x) + LayerNorm1 + FFN + residual +
    # LayerNorm2.  Grid = (row_tiles, k_tiles); the FFN hidden dim (4D) is
    # streamed in k_tile chunks (w1 column block / w2 row block) and the w2
    # product is accumulated into a (tile, D) f32 scratch.
    k = pl.program_id(1)

    @pl.when(k == 0)
    def _():
        proj = jnp.dot(att_ref[...], wo_ref[...],
                       preferred_element_type=jnp.float32)
        y = proj + x_ref[...]                                  # residual = pre_value
        mu = jnp.mean(y, axis=-1, keepdims=True)
        yc = y - mu
        var = jnp.mean(yc * yc, axis=-1, keepdims=True)        # two-pass variance
        y_sc[...] = yc * jax.lax.rsqrt(var + 1e-5) * g1_ref[...] + be1_ref[...]
        acc_sc[...] = jnp.zeros_like(acc_sc)

    h = jnp.dot(y_sc[...].astype(jnp.bfloat16), w1_ref[...],
                preferred_element_type=jnp.float32) + b1_ref[...]
    h = jnp.maximum(h, 0.0)
    acc_sc[...] += jnp.dot(h.astype(jnp.bfloat16), w2_ref[...],
                           preferred_element_type=jnp.float32)

    @pl.when(k == pl.num_programs(1) - 1)
    def _():
        z = y_sc[...] + acc_sc[...] + b2_ref[...]              # dropout = identity
        mu2 = jnp.mean(z, axis=-1, keepdims=True)
        zc = z - mu2
        var2 = jnp.mean(zc * zc, axis=-1, keepdims=True)
        o_ref[...] = zc * jax.lax.rsqrt(var2 + 1e-5) * g2_ref[...] + be2_ref[...]


# --------------------------------------------------------------------------
# Pallas call wrappers
# --------------------------------------------------------------------------

def qkv_proj(x2, wqkv, row_tile, vmem_limit):
    rows, D = x2.shape
    # TODO(synk): for very large D, N/K-tile the (D, 3D) weight instead of
    # keeping it fully resident in VMEM.
    return pl.pallas_call(
        _qkv_kernel,
        out_shape=jax.ShapeDtypeStruct((rows, 3 * D), jnp.bfloat16),
        grid=(rows // row_tile,),
        in_specs=[pl.BlockSpec((row_tile, D), lambda i: (i, 0)),
                  _const_spec(wqkv)],
        out_specs=pl.BlockSpec((row_tile, 3 * D), lambda i: (i, 0)),
        compiler_params=pltpu.CompilerParams(
            dimension_semantics=("parallel",),
            vmem_limit_bytes=vmem_limit),
    )(x2, wqkv)


def multi_head_attention(qh, kh, vh, hidden_dim, vmem_limit):
    B, H, S2, hd = qh.shape
    qt = _pick_q_tile(S2, H, hd, vmem_limit)
    q_spec = pl.BlockSpec((1, H, qt, hd), lambda b, qi: (b, 0, qi, 0))
    kv_spec = pl.BlockSpec((1, H, S2, hd), lambda b, qi: (b, 0, 0, 0))
    kern = functools.partial(_attention_kernel,
                             scale=1.0 / math.sqrt(hidden_dim))
    return pl.pallas_call(
        kern,
        out_shape=jax.ShapeDtypeStruct((B, H, S2, hd), jnp.bfloat16),
        grid=(B, S2 // qt),
        in_specs=[q_spec, kv_spec, kv_spec],
        out_specs=q_spec,
        compiler_params=pltpu.CompilerParams(
            dimension_semantics=("parallel", "parallel"),
            vmem_limit_bytes=vmem_limit),
    )(qh, kh, vh)


def post_attention_ffn(att2, x2, p, row_tile, k_tile, vmem_limit):
    rows, D = x2.shape
    hidden = p["w1"].shape[1]
    row_spec = pl.BlockSpec((row_tile, D), lambda i, k: (i, 0))
    w1_spec = pl.BlockSpec((D, k_tile), lambda i, k: (0, k))
    b1_spec = pl.BlockSpec((1, k_tile), lambda i, k: (0, k))
    w2_spec = pl.BlockSpec((k_tile, D), lambda i, k: (k, 0))
    return pl.pallas_call(
        _post_attn_ffn_kernel,
        out_shape=jax.ShapeDtypeStruct((rows, D), jnp.float32),
        grid=(rows // row_tile, hidden // k_tile),
        in_specs=[row_spec, row_spec,
                  _const_spec(p["wo"]), _const_spec(p["ln1_g"]), _const_spec(p["ln1_b"]),
                  w1_spec, b1_spec, w2_spec,
                  _const_spec(p["b2"]), _const_spec(p["ln2_g"]), _const_spec(p["ln2_b"])],
        out_specs=row_spec,
        scratch_shapes=[pltpu.VMEM((row_tile, D), jnp.float32),   # y after LN1
                        pltpu.VMEM((row_tile, D), jnp.float32)],  # FFN accumulator
        compiler_params=pltpu.CompilerParams(
            dimension_semantics=("parallel", "arbitrary"),
            vmem_limit_bytes=vmem_limit),
    )(att2, x2, p["wo"], p["ln1_g"], p["ln1_b"],
      p["w1"], p["b1"], p["w2"], p["b2"], p["ln2_g"], p["ln2_b"])


# --------------------------------------------------------------------------
# Encoder forward (stack of EncoderBlocks)
# --------------------------------------------------------------------------

def encoder_block_forward(x, p, n_heads, hidden_dim):
    B, S, D = x.shape
    rows = B * S
    x2 = x.reshape(rows, D)

    vmem_limit = _vmem_limit_bytes()
    k_tile = _pick_k_tile(4 * D)
    row_tile = _pick_row_tile(rows, D, k_tile, vmem_limit)

    # --- MultiHeaderAttention ---
    qkv = qkv_proj(x2, p["wqkv"], row_tile, vmem_limit)       # (rows, 3D) bf16
    q, k, v = qkv[:, :D], qkv[:, D:2 * D], qkv[:, 2 * D:]
    # faithful reproduction of q.view(B, n_heads, -1, hidden_dim):
    # plain contiguous row-major reshape (free metadata-only glue).
    S2 = (S * D) // (n_heads * hidden_dim)
    qh = q.reshape(B, n_heads, S2, hidden_dim)
    kh = k.reshape(B, n_heads, S2, hidden_dim)
    vh = v.reshape(B, n_heads, S2, hidden_dim)
    att = multi_head_attention(qh, kh, vh, hidden_dim, vmem_limit)
    att2 = att.reshape(rows, D)                               # attention.view(B, S, D)

    # --- out-proj + add&norm + FFN (k-tiled) + add&norm, fused ---
    out2 = post_attention_ffn(att2, x2, p, row_tile, k_tile, vmem_limit)
    return out2.reshape(B, S, D)


def encoder_forward(x, params, n_heads, hidden_dim):
    for p in params:
        x = encoder_block_forward(x, p, n_heads, hidden_dim)
    return x


# --------------------------------------------------------------------------
# Deterministic parameter init (shapes follow the PyTorch module)
# --------------------------------------------------------------------------

def init_params(key, d_model, n_stack):
    params = []
    for layer in range(n_stack):
        keys = jax.random.split(jax.random.fold_in(key, layer), 8)

        def lin(k, fan_in, fan_out):
            bound = 1.0 / math.sqrt(fan_in)
            # stored as (in, out) == W_pt.T
            return jax.random.uniform(k, (fan_in, fan_out), jnp.float32,
                                      -bound, bound)

        wq = lin(keys[0], d_model, d_model)
        wk = lin(keys[1], d_model, d_model)
        wv = lin(keys[2], d_model, d_model)
        p = {
            # matmul weights stored in bf16 (MXU operands); biases / LN in f32
            # TODO(synk): optional fp8(e4m3) weight storage on v7x with a
            # per-tensor scale (accuracy validation required).
            "wqkv": jnp.concatenate([wq, wk, wv], axis=1).astype(jnp.bfloat16),
            "wo": lin(keys[3], d_model, d_model).astype(jnp.bfloat16),
            "ln1_g": jnp.ones((1, d_model), jnp.float32),
            "ln1_b": jnp.zeros((1, d_model), jnp.float32),
            "w1": lin(keys[4], d_model, d_model * 4).astype(jnp.bfloat16),
            "b1": jax.random.uniform(keys[5], (1, d_model * 4), jnp.float32,
                                     -1.0 / math.sqrt(d_model),
                                     1.0 / math.sqrt(d_model)),
            "w2": lin(keys[6], d_model * 4, d_model).astype(jnp.bfloat16),
            "b2": jax.random.uniform(keys[7], (1, d_model), jnp.float32,
                                     -1.0 / math.sqrt(d_model * 4),
                                     1.0 / math.sqrt(d_model * 4)),
            "ln2_g": jnp.ones((1, d_model), jnp.float32),
            "ln2_b": jnp.zeros((1, d_model), jnp.float32),
        }
        params.append(p)
    return params


# --------------------------------------------------------------------------

if __name__ == "__main__":
    # Encoder(d_model=32, hidden_dim=8, n_heads=4, n_stack=2, dropout=0.1)
    d_model, hidden_dim, n_heads, n_stack = 32, 8, 4, 2
    B, S = 2, 8

    key = jax.random.PRNGKey(0)
    x = jax.random.normal(jax.random.fold_in(key, 123), (B, S, d_model),
                          dtype=jnp.float32)
    params = init_params(key, d_model, n_stack)

    out = encoder_forward(x, params, n_heads, hidden_dim)
    out = jax.block_until_ready(out)
    assert out.shape == (B, S, d_model)
    assert bool(jnp.all(jnp.isfinite(out)))
    print("KERNEL_OK")
</pallas_src>

<mosaic_0001>
module attributes {stable_mosaic.version = 11 : i64} {
  func.func @probe(%arg0: i32, %arg1: memref<8x128xf32, #tpu.memory_space<vmem>>, %arg2: memref<8x128xf32, #tpu.memory_space<vmem>>) attributes {dimension_semantics = [#tpu.dimension_semantics<arbitrary>], iteration_bounds = array<i64: 2>, scalar_prefetch = 0 : i64, scratch_operands = 0 : i64, tpu.core_type = #tpu.core_type<tc>, window_params = [{pipeline_mode = #tpu.pipeline_mode<synchronous>, transform_indices = @transform_0, window_bounds = array<i64: 8, 128>}, {transform_indices = @transform_1, window_bounds = array<i64: 8, 128>}]} {
    %c0 = arith.constant 0 : index
    %c0_0 = arith.constant 0 : index
    %0 = vector.load %arg1[%c0, %c0_0] : memref<8x128xf32, #tpu.memory_space<vmem>>, vector<8x128xf32>
    %cst = arith.constant 2.000000e+00 : f32
    %1 = vector.broadcast %cst : f32 to vector<8x128xf32>
    %2 = arith.mulf %0, %1 : vector<8x128xf32>
    %c0_1 = arith.constant 0 : index
    %c0_2 = arith.constant 0 : index
    %3 = vector.load %arg2[%c0_1, %c0_2] : memref<8x128xf32, #tpu.memory_space<vmem>>, vector<8x128xf32>
    tpu.vector_store %arg2[%c0_1, %c0_2], %2 {strides = array<i32>} : memref<8x128xf32, #tpu.memory_space<vmem>>, vector<8x128xf32>,
    return
  }
  func.func @transform_0(%arg0: i32) -> (i32, i32) {
    %c0_i32 = arith.constant 0 : i32
    %c0_i32_0 = arith.constant 0 : i32
    %c0_i32_1 = arith.constant 0 : i32
    return %c0_i32, %c0_i32_0 : i32, i32
  }
  func.func @transform_1(%arg0: i32) -> (i32, i32) {
    %c0_i32 = arith.constant 0 : i32
    %c0_i32_0 = arith.constant 0 : i32
    return %arg0, %c0_i32 : i32, i32
  }
}

module attributes {stable_mosaic.version = 11 : i64} {
  func.func @_qkv_kernel(%arg0: i32, %arg1: memref<8x32xf32, #tpu.memory_space<vmem>>, %arg2: memref<32x96xbf16, #tpu.memory_space<vmem>>, %arg3: memref<8x96xbf16, #tpu.memory_space<vmem>>) attributes {dimension_semantics = [#tpu.dimension_semantics<parallel>], iteration_bounds = array<i64: 2>, scalar_prefetch = 0 : i64, scratch_operands = 0 : i64, tpu.core_type = #tpu.core_type<tc>, window_params = [{transform_indices = @transform_0, window_bounds = array<i64: 8, 32>}, {pipeline_mode = #tpu.pipeline_mode<synchronous>, transform_indices = @transform_1, window_bounds = array<i64: 32, 96>}, {transform_indices = @transform_2, window_bounds = array<i64: 8, 96>}]} {
    %c0 = arith.constant 0 : index
    %c0_0 = arith.constant 0 : index
    %0 = vector.load %arg1[%c0, %c0_0] : memref<8x32xf32, #tpu.memory_space<vmem>>, vector<8x32xf32>
    %1 = arith.truncf %0 : vector<8x32xf32> to vector<8x32xbf16>
    %c0_1 = arith.constant 0 : index
    %c0_2 = arith.constant 0 : index
    %2 = vector.load %arg2[%c0_1, %c0_2] : memref<32x96xbf16, #tpu.memory_space<vmem>>, vector<32x96xbf16>
    %cst = arith.constant dense<0.000000e+00> : vector<8x96xf32>
    %3 = tpu.matmul %1, %2, %cst {dimension_numbers = #tpu.dot_dimension_numbers<[1], [0], [0], [1], [0, 0, 1, 1], [], []>} : vector<8x32xbf16>, vector<32x96xbf16>, vector<8x96xf32> -> vector<8x96xf32>
    %4 = arith.truncf %3 : vector<8x96xf32> to vector<8x96xbf16>
    %c0_3 = arith.constant 0 : index
    %c0_4 = arith.constant 0 : index
    %5 = vector.load %arg3[%c0_3, %c0_4] : memref<8x96xbf16, #tpu.memory_space<vmem>>, vector<8x96xbf16>
    tpu.vector_store %arg3[%c0_3, %c0_4], %4 {strides = array<i32>} : memref<8x96xbf16, #tpu.memory_space<vmem>>, vector<8x96xbf16>,
    return
  }
  func.func @transform_0(%arg0: i32) -> (i32, i32) {
    %c0_i32 = arith.constant 0 : i32
    %c0_i32_0 = arith.constant 0 : i32
    return %arg0, %c0_i32 : i32, i32
  }
  func.func @transform_1(%arg0: i32) -> (i32, i32) {
    %c0_i32 = arith.constant 0 : i32
    %c0_i32_0 = arith.constant 0 : i32
    %c0_i32_1 = arith.constant 0 : i32
    return %c0_i32, %c0_i32_0 : i32, i32
  }
  func.func @transform_2(%arg0: i32) -> (i32, i32) {
    %c0_i32 = arith.constant 0 : i32
    %c0_i32_0 = arith.constant 0 : i32
    return %arg0, %c0_i32 : i32, i32
  }
}

</mosaic_0001>

<bundles_post_ra>
// kernel: tpu_custom_call.1
= control target key start
LH: loop header
LB: loop body
LE: loop exit
PB: predicated region body
PF: predicated region fallthrough
CT: control target
= control target key end

     0   :  { %6 = vsyncpa [#allocation3], 0  ;;  %s482_s0 = inlined_call_operand.hbm [shape: f32[8,128], index: 0, kind: input, shape index: {}]   ;;  %s483_s1 = inlined_call_operand.hbm [shape: f32[16,128], index: 1, kind: output, shape index: {}]  }
   0x1   :  { %7 = vsyncpa [#allocation4], 0 }
   0x2   :  { %9 = vsyncpa [#allocation4 + $0x1], 0  ;;  %s352_s6 = smov 0   ;;  %s354_s7 = smov 0  }
   0x3   :  { %s356_s8 = smov 0   ;;  %s358_s9 = smov 0  }
   0x4 LB: > { %s373_s10 = sadd.s32 4294967295, %s338_s9   ;;  %s184_s11 = sadd.s32 4294967294, %s338_s9   ;;  %s338_s9 = sphi %s358_s9, %s499_s9   ;;  %s334_s8 = sphi %s356_s8, %s498_s8   ;;  %s330_s7 = sphi %s354_s7, %s497_s7   ;;  %s326_s6 = sphi %s352_s6, %s496_s6  }
   0x5   : > { %s377_s12 = sadd.s32 1, %s338_s9   ;;  %s43_s13 = sadd.s32 1, %s334_s8 }
   0x6   : > { %s40_s14 = ssub.s32 %s338_s9, %s377_s12  ;;  %p53_p0 = scmp.ne.s32.totalorder %s334_s8, %s330_s7 }
   0x7   : > { %p41_p1 = scmp.eq.s32.totalorder %s40_s14, 0  ;;  %p54_p2 = scmp.eq.s32.totalorder %s373_s10, 1 }
   0x8   : > { %p59_p3 = scmp.ne.s32.totalorder %s330_s7, %s326_s6  ;;  %p60_p4 = scmp.eq.s32.totalorder %s184_s11, 1 }
   0x9   : > { %s388_s15 = scalar_select %p41_p1, %s334_s8, %s43_s13  }
   0xa   : > { %p390_p5 = por %p54_p2, %p53_p0  ;;  %p394_p6 = por %p60_p4, %p59_p3 }
   0xb   : > { %p185_p7 = scmp.ge.s32.totalorder %s338_s9, 1  ;;  %p67_p8 = scmp.lt.s32.totalorder %s338_s9, 3 }
   0xc   : > { %s487_s16 = scalar_select %p390_p5, 1, 0 }
   0xd   : > { %s488_s17 = scalar_select %p394_p6, 1, 0 }
   0xe   : > { %p484_p9 = scmp.eq.s32.totalorder %s373_s10, 0  ;;  %p401_p10 = pnand %p185_p7, %p67_p8 }
   0xf   : > { %s340_s19 = smov [#allocation2]   ;;  %s244_s24 = scalar_lea.hbm %s482_s0, 128 }
  0x10   : > { %s489_s18 = scalar_select %p401_p10, 1, 0 }
  0x11   : > { %s80_s20 = sshll.u32 %s340_s19, 4  ;;  %p200_p11 = pneg %p401_p10  ;;  %s81_s20 = int_to_ptr.vmem [resolvable:$true] %s80_s20 }
  0x12   : > { %p245_p13 = scmp.ne.s32.totalorder %s482_s0, %s244_s24  ;;  %p251_p3 = scmp.lt.u32.totalorder %s244_s24, %s482_s0 }
  0x13   : > { %p409_p12 = pnand %p484_p9, %p200_p11 }
  0x15   : > { %p246_p0 = pneg %p409_p12 }
  0x17   : > { %p247_p1 = pnand %p246_p0, %p245_p13 }
  0x19   : > { %p248_p2 = pneg %p247_p1 }
  0x1b   : > { %p253_p4 = pnand %p251_p3, %p248_p2 }
  0x1d   : > { %256 = shalt.err (!%p253_p4)
}
  0x1e   : > { %s257_s29 = scalar_lea.vmem %s81_s20, 128  ;;  %p265_p9 = scmp.lt.s32.totalorder %s81_s20, %s81_s20 }
  0x1f   : > { %p258_p7 = scmp.ne.s32.totalorder %s81_s20, %s257_s29  ;;  %p266_p6 = scmp.lt.s32.totalorder %s257_s29, %s257_s29 }
  0x21   : > { %p260_p8 = pnand %p258_p7, %p246_p0  ;;  %p267_p5 = por %p266_p6, %p265_p9 }
  0x23   : > { %p261_p11 = pneg %p260_p8 }
  0x25   : > { %p268_p10 = pnand %p267_p5, %p261_p11 }
  0x27   : > { %271 = shalt.err (!%p268_p10)
}
  0x28   : > { %203 = dma.hbm_to_vmem [thread:$0]  (!%p409_p12), %s482_s0, 128, %s81_s20, [#allocation3]  }
  0x29   : > { %p491_p13 = scmp.ne.s32.totalorder %s489_s18, 0 }
  0x2a   : > { %p492_p1 = scmp.eq.s32.totalorder (!%p491_p13), %s373_s10, 0 }
  0x2b   : > { %93 = sbr.rel (%p491_p13) target bundleno = 77 (0x4d), region = 24 }
  0x32   : > { %317 = dma.done.wait (%p492_p1), [#allocation3], 128   ;;  %p493_p0 = pmov %p492_p1 }
  0x33   : > { %s105_s3 = sand.u32 1, %s330_s7   ;;  %s191_s13 = sshll.u32 %s373_s10, 7  ;;  %v108_v0 = vld [vmem:[#allocation2] sm:$0xff] }
  0x34   : > { %319 = vsyncadd (%p493_p0), [#allocation3], 4294967168  ;;  %s189_s4 = sshll.u32 %s105_s3, 3  ;;  %v109_v1 = vmul.f32 2.0, %v108_v0  ;;  %s442_s19 = scalar_lea.hbm %s483_s1, %s191_s13 }
  0x35   : > { %s107_s5 = scalar_lea.vmem [#allocation5], %s189_s4  ;;  %s112_s20 = scalar_lea.sflag [#allocation4], %s105_s3 }
  0x36   : > { %s125_s11 = sshll.u32 %s107_s5, 4  ;;  %110 = vst [vmem:[%s107_s5] sm:$0xff] %v109_v1  ;;  %p494_p6 = scmp.ne.s32.totalorder %s487_s16, 0  ;;  %s437_s11 = int_to_ptr.vmem [resolvable:$true] %s125_s11 }
  0x37   : > { %s272_s21 = scalar_lea.vmem %s437_s11, 128  ;;  %s341_s10 = smov [#allocation5]  }
  0x38   : > { %p273_p5 = scmp.ne.s32.totalorder %s437_s11, %s272_s21  ;;  %s276_s22 = sshll.u32 %s341_s10, 4  ;;  %s277_s22 = int_to_ptr.vmem [resolvable:$false] %s276_s22 }
  0x39   : > { %s278_s23 = scalar_lea.vmem %s277_s22, 256  ;;  %p279_p12 = scmp.lt.s32.totalorder %s437_s11, %s277_s22 }
  0x3a   : > { %p274_p9 = pnand %p273_p5, %p494_p6  ;;  %p280_p2 = scmp.lt.s32.totalorder %s278_s23, %s272_s21 }
  0x3c   : > { %p275_p10 = pneg %p274_p9  ;;  %p281_p3 = por %p280_p2, %p279_p12 }
  0x3e   : > { %p282_p4 = pnand %p281_p3, %p275_p10 }
  0x40   : > { %285 = shalt.err (!%p282_p4)
}
  0x41   : > { %s286_s24 = scalar_lea.hbm %s442_s19, 128  ;;  %s290_s27 = scalar_lea.hbm %s483_s1, 256 }
  0x42   : > { %p287_p7 = scmp.ne.s32.totalorder %s442_s19, %s286_s24  ;;  %p291_p13 = scmp.lt.u32.totalorder %s442_s19, %s483_s1 }
  0x43   : > { %p292_p1 = scmp.lt.u32.totalorder %s290_s27, %s286_s24  ;;  %p294_p5 = scmp.lt.u32.totalorder %s286_s24, %s442_s19 }
  0x44   : > { %p288_p8 = pnand %p287_p7, %p494_p6 }
  0x45   : > { %p293_p0 = por %p292_p1, %p291_p13 }
  0x46   : > { %p289_p11 = pneg %p288_p8 }
  0x47   : > { %p295_p9 = por %p294_p5, %p293_p0 }
  0x49   : > { %p296_p10 = pnand %p295_p9, %p289_p11 }
  0x4b   : > { %299 = shalt.err (!%p296_p10)
}
  0x4c   : > { %198 = dma.vmem_to_hbm [thread:$0]  (%p494_p6), %s437_s11, 128, %s442_s19, %s112_s20  }
  0x4d PF: > { %p210_p12 = scmp.ge.s32.totalorder %s338_s9, 2  ;;  %s137_s30 = sand.u32 1, %s326_s6  }
  0x4e   : > { %p495_p2 = scmp.ne.s32.totalorder %s488_s17, 0  ;;  %s138_s2 = scalar_lea.sflag [#allocation4], %s137_s30 }
  0x50   : > { %p205_p3 = pnand %p210_p12, %p495_p2 }
  0x52   : > { %321 = dma.done.wait (!%p205_p3), %s138_s2, 128  }
  0x53   : > { %323 = vsyncadd (!%p205_p3), %s138_s2, 4294967168  ;;  %p12_p4 = scmp.ge.s32.totalorder %s377_s12, 4   ;;  %s496_s6 = smov %s330_s7 }
  0x54   : > { %s497_s7 = smov %s334_s8  ;;  %s498_s8 = smov %s388_s15 }
  0x55   : > { %s499_s9 = smov %s377_s12  ;;  %14 = sbr.rel (!%p12_p4) target bundleno = 4 (0x4), region = 61 }
  0x5c   :  { %143 = vsyncpa [#allocation3], 1 }
  0x5d   :  { %145 = vsyncpa [#allocation3 + $0x1], 1 }
  0x5e   :  { %146 = vsyncpa [#allocation4], 1 }
  0x5f   :  { %148 = vsyncpa [#allocation4 + $0x1], 1 }

// kernel: tpu_custom_call.1
= control target key start
LH: loop header
LB: loop body
LE: loop exit
PB: predicated region body
PF: predicated region fallthrough
CT: control target
= control target key end

     0   :  { %7 = vsyncpa [#allocation3], 0  ;;  %s774_s0 = inlined_call_operand.hbm [shape: f32[16,32], index: 0, kind: input, shape index: {}]   ;;  %s775_s1 = inlined_call_operand.hbm [shape: bf16[32,96], index: 1, kind: input, shape index: {}]   ;;  %s776_s2 = inlined_call_operand.hbm [shape: bf16[16,96], index: 2, kind: output, shape index: {}]  }
   0x1   :  { %9 = vsyncpa [#allocation3 + $0x1], 0 }
   0x2   :  { %10 = vsyncpa [#allocation6], 0 }
   0x3   :  { %11 = vsyncpa [#allocation4], 0 }
   0x4   :  { %13 = vsyncpa [#allocation4 + $0x1], 0  ;;  %s577_s9 = smov 0   ;;  %s579_s10 = smov 0  }
   0x5   :  { %s581_s11 = smov 0   ;;  %s583_s12 = smov 0  }
   0x6 LB: > { %s598_s13 = sadd.s32 4294967295, %s553_s12   ;;  %s334_s14 = sadd.s32 4294967294, %s553_s12   ;;  %s553_s12 = sphi %s583_s12, %s796_s12   ;;  %s549_s11 = sphi %s581_s11, %s795_s11   ;;  %s545_s10 = sphi %s579_s10, %s794_s10   ;;  %s541_s9 = sphi %s577_s9, %s793_s9  }
   0x7   : > { %p39_p0 = scmp.ne.s32.totalorder %s545_s10, %s541_s9  ;;  %p777_p1 = scmp.eq.s32.totalorder %s598_s13, 0 }
   0x8   : > { %p90_p3 = scmp.eq.s32.totalorder %s334_s14, 1  ;;  %p335_p5 = scmp.ge.s32.totalorder %s553_s12, 1 }
   0x9   : > { %p607_p4 = por %p777_p1, %p39_p0  ;;  %p97_p7 = scmp.lt.s32.totalorder %s553_s12, 3 }
   0xa   : > { %p612_p6 = por %p90_p3, %p39_p0  ;;  %s555_s18 = smov [#allocation5]  }
   0xb   : > { %s780_s15 = scalar_select %p607_p4, 1, 0 }
   0xc   : > { %s781_s16 = scalar_select %p612_p6, 1, 0 }
   0xd   : > { %p617_p8 = pnand %p335_p5, %p97_p7  ;;  %s109_s19 = sshll.u32 %s555_s18, 4  ;;  %s621_s19 = int_to_ptr.vmem [resolvable:$true] %s109_s19 }
   0xe   : > { %s633_s21 = sadd.s32 1, %s553_s12   ;;  %s26_s22 = sadd.s32 1, %s549_s11 }
   0xf   : > { %s782_s17 = scalar_select %p617_p8, 1, 0 }
  0x10   : > { %p370_p9 = pneg %p617_p8  ;;  %s23_s23 = ssub.s32 %s553_s12, %s633_s21 }
  0x11   : > { %s425_s26 = scalar_lea.hbm %s775_s1, 256 }
  0x12   : > { %p628_p11 = pnand %p370_p9, %p777_p1  ;;  %p426_p12 = scmp.ne.s32.totalorder %s775_s1, %s425_s26 }
  0x13   : > { %p432_p5 = scmp.lt.u32.totalorder %s425_s26, %s775_s1 }
  0x14   : > { %p427_p13 = pneg %p628_p11 }
  0x16   : > { %p428_p0 = pnand %p427_p13, %p426_p12 }
  0x18   : > { %p429_p3 = pneg %p428_p0 }
  0x1a   : > { %p434_p7 = pnand %p432_p5, %p429_p3 }
  0x1c   : > { %437 = shalt.err (!%p434_p7)
}
  0x1d   : > { %s438_s3 = scalar_lea.vmem %s621_s19, 256  ;;  %p446_p2 = scmp.lt.s32.totalorder %s621_s19, %s621_s19 }
  0x1e   : > { %p439_p9 = scmp.ne.s32.totalorder %s621_s19, %s438_s3  ;;  %p447_p6 = scmp.lt.s32.totalorder %s438_s3, %s438_s3 }
  0x20   : > { %p441_p10 = pnand %p439_p9, %p427_p13  ;;  %p448_p4 = por %p447_p6, %p446_p2 }
  0x22   : > { %p442_p1 = pneg %p441_p10 }
  0x24   : > { %p449_p8 = pnand %p448_p4, %p442_p1 }
  0x26   : > { %452 = shalt.err (!%p449_p8)
}
  0x27   : > { %s556_s4 = smov 64   ;;  %s557_s5 = smov 4  }
  0x28   : > { %373 = dma.hbm_to_vmem [thread:$0]  (!%p628_p11), %s775_s1, 256, %s621_s19, [#allocation6], %s556_s4, %s556_s4, %s557_s5  }
  0x29   : > { %p24_p2 = scmp.eq.s32.totalorder %s23_s23, 0  ;;  %p33_p1 = scmp.ne.s32.totalorder %s549_s11, %s545_s10 }
  0x2a   : > { %p34_p4 = scmp.eq.s32.totalorder %s553_s12, 0  ;;  %p383_p6 = scmp.lt.s32.totalorder %s553_s12, 2 }
  0x2b   : > { %s664_s8 = scalar_select %p24_p2, %s549_s11, %s26_s22  }
  0x2c   : > { %p35_p8 = por %p34_p4, %p33_p1  ;;  %p784_p10 = scmp.eq.s32.totalorder %s598_s13, 1 }
  0x2d   : > { %s123_s18 = sand.u32 1, %s549_s11   ;;  %s339_s24 = sshll.u32 %s553_s12, 7 }
  0x2e   : > { %p668_p12 = por %p784_p10, %p33_p1  ;;  %s338_s25 = sshll.u32 %s123_s18, 3 }
  0x2f   : > { %s677_s27 = scalar_lea.hbm %s774_s0, %s339_s24  ;;  %s127_s19 = scalar_lea.vmem [#allocation2], %s338_s25 }
  0x30   : > { %s134_s22 = sshll.u32 %s127_s19, 4  ;;  %p679_p11 = pnand %p383_p6, %p35_p8  ;;  %s683_s22 = int_to_ptr.vmem [resolvable:$true] %s134_s22 }
  0x31   : > { %s124_s28 = scalar_lea.sflag [#allocation3], %s123_s18  ;;  %s453_s29 = scalar_lea.hbm %s677_s27, 128 }
  0x32   : > { %p454_p13 = scmp.ne.s32.totalorder %s677_s27, %s453_s29  ;;  %p455_p0 = pneg %p679_p11 }
  0x33   : > { %s458_s4 = scalar_lea.hbm %s774_s0, 256  ;;  %p459_p7 = scmp.lt.u32.totalorder %s677_s27, %s774_s0 }
  0x34   : > { %p456_p3 = pnand %p455_p0, %p454_p13  ;;  %p460_p9 = scmp.lt.u32.totalorder %s458_s4, %s453_s29 }
  0x35   : > { %p462_p1 = scmp.lt.u32.totalorder %s453_s29, %s677_s27 }
  0x36   : > { %p457_p5 = pneg %p456_p3  ;;  %p461_p2 = por %p460_p9, %p459_p7 }
  0x38   : > { %p463_p4 = por %p462_p1, %p461_p2 }
  0x3a   : > { %p464_p6 = pnand %p463_p4, %p457_p5 }
  0x3c   : > { %467 = shalt.err (!%p464_p6)
}
  0x3d   : > { %s468_s7 = scalar_lea.vmem %s683_s22, 128  ;;  %s558_s18 = smov [#allocation2]  }
  0x3e   : > { %p469_p8 = scmp.ne.s32.totalorder %s683_s22, %s468_s7  ;;  %s473_s24 = sshll.u32 %s558_s18, 4  ;;  %s474_s24 = int_to_ptr.vmem [resolvable:$false] %s473_s24 }
  0x3f   : > { %s475_s25 = scalar_lea.vmem %s474_s24, 256  ;;  %p476_p3 = scmp.lt.s32.totalorder %s683_s22, %s474_s24 }
  0x40   : > { %p471_p10 = pnand %p469_p8, %p455_p0  ;;  %p477_p7 = scmp.lt.s32.totalorder %s475_s25, %s468_s7 }
  0x42   : > { %p472_p13 = pneg %p471_p10  ;;  %p478_p9 = por %p477_p7, %p476_p3 }
  0x44   : > { %p479_p2 = pnand %p478_p9, %p472_p13 }
  0x46   : > { %482 = shalt.err (!%p479_p2)
}
  0x47   : > { %377 = dma.hbm_to_vmem [thread:$0]  (!%p679_p11), %s677_s27, 128, %s683_s22, %s124_s28  }
  0x48   : > { %p787_p5 = scmp.ne.s32.totalorder %s782_s17, 0 }
  0x49   : > { %s713_s20 = sand.u32 (!%p787_p5), 1, %s545_s10   ;;  %p788_p0 = scmp.ne.s32.totalorder (!%p787_p5), %s780_s15, 0 }
  0x4a   : > { %143 = sbr.rel (%p787_p5) target bundleno = 322 (0x142), region = 28  ;;  %s341_s26 = sshll.u32 (!%p787_p5), %s713_s20, 3 }
  0x4b   : > { %s146_s19 = scalar_lea.sflag (!%p787_p5), [#allocation3], %s713_s20  ;;  %s149_s29 = scalar_lea.vmem (!%p787_p5), [#allocation2], %s341_s26 }
  0x51   : > { %528 = dma.done.wait (%p788_p0), %s146_s19, 128  }
  0x52   : > { %530 = vsyncadd (%p788_p0), %s146_s19, 4294967168  ;;  %p789_p1 = scmp.eq.s32.totalorder %s598_s13, 0 }
  0x54   : > { %532 = dma.done.wait (%p789_p1), [#allocation6], 256   ;;  %p790_p11 = pmov %p789_p1 }
  0x55   : > { %v559_v0 = vmov 0.0   ;;  %vm560_vm0 = vmmov 0   ;;  %v423_v1 = vld [vmem:[#allocation5] sm:$0xff]   ;;  %v424_v2 = vld [vmem:[#allocation5 + $0x8] sm:$0xff]   ;;  %v175_v3 = vld [vmem:[%s149_s29] sm:$0xff]  ;;  %vm193_vm1 = vcmask 261120  }
  0x56   : > { %534 = vsyncadd (%p790_p11), [#allocation6], 4294967040  ;;  %354 = vmatprep.subr.bf16.mxu0 %v559_v0  ;;  %358 = vmatprep.mubr.msk.bf16.mxu0 %vm560_vm0, %v559_v0  ;;  %v176_v4 = vpack.c.bf16 %v175_v3, %v175_v3  ;;  %s343_s15 = sshll.u32 %s713_s20, 2  ;;  %s348_s17 = sshll.u32 %s598_s13, 6  ;;  %vm238_vm2 = vcmask 781312  }
  0x57   : > { %355 = vmatpush3.bf16.msra.mxu0 %v423_v1  ;;  %s173_s27 = scalar_lea.vmem [#allocation7], %s343_s15  ;;  %s730_s30 = scalar_lea.hbm %s776_s2, %s348_s17 }
  0x58   : > { %356 = vmatprep.subr.bf16.mxu0 %v559_v0  ;;  %s254_s22 = sshll.u32 %s173_s27, 4  ;;  %s241_s13 = scalar_lea.sflag [#allocation4], %s713_s20  ;;  %s732_s22 = int_to_ptr.vmem [resolvable:$true] %s254_s22 }
  0x59   : > { %s483_s3 = scalar_lea.vmem %s732_s22, 64  ;;  %s561_s4 = smov [#allocation7]  }
  0x5a   : > { %p484_p4 = scmp.ne.s32.totalorder %s732_s22, %s483_s3  ;;  %s487_s5 = sshll.u32 %s561_s4, 4  ;;  %s488_s5 = int_to_ptr.vmem [resolvable:$false] %s487_s5 }
  0x5b   : > { %357 = vmatpush3.bf16.msra.mxu0 %v424_v2  ;;  %s489_s6 = scalar_lea.vmem %s488_s5, 128  ;;  %p490_p10 = scmp.lt.s32.totalorder %s732_s22, %s488_s5 }
  0x5c   : > { %p485_p6 = pnand %p484_p4, %p668_p12  ;;  %p491_p13 = scmp.lt.s32.totalorder %s489_s6, %s483_s3 }
  0x5e   : > { %359 = vmatmul.mubr.msk.bf16.vlgmr.msra.gmra.mrb[0].mxu0 %vm193_vm1, %v176_v4  ;;  %p486_p8 = pneg %p485_p6  ;;  %p492_p3 = por %p491_p13, %p490_p10 }
  0x60   : > { %p493_p7 = pnand %p492_p3, %p486_p8 }
 0x131   : > { %v231_v5 = vpop.f32.mrb[0].mxu0 }
 0x132   : > { %v237_v6 = vpack.c.bf16 %v231_v5, %v231_v5  ;;  %v360_v7 = vpop.f32.mrb[1].mxu0 }
 0x133   : > { %v234_v8 = vpop.f32.mrb[2].mxu0 }
 0x134   : > { %v361_v9 = vpop.f32.mrb[3].mxu0  ;;  %239 = vst.msk [vmem:[%s173_s27] sm:$0xf] %vm238_vm2, %v237_v6 }
 0x135   : > { %496 = shalt.err (!%p493_p7)
}
 0x136   : > { %s497_s7 = scalar_lea.hbm %s730_s30, 64  ;;  %s501_s25 = scalar_lea.hbm %s776_s2, 128 }
 0x137   : > { %p498_p9 = scmp.ne.s32.totalorder %s730_s30, %s497_s7  ;;  %p502_p0 = scmp.lt.u32.totalorder %s730_s30, %s776_s2 }
 0x138   : > { %p503_p1 = scmp.lt.u32.totalorder %s501_s25, %s497_s7  ;;  %p505_p4 = scmp.lt.u32.totalorder %s497_s7, %s730_s30 }
 0x139   : > { %p499_p2 = pnand %p498_p9, %p668_p12 }
 0x13a   : > { %p504_p11 = por %p503_p1, %p502_p0 }
 0x13b   : > { %p500_p5 = pneg %p499_p2 }
 0x13c   : > { %p506_p6 = por %p505_p4, %p504_p11 }
 0x13e   : > { %p507_p8 = pnand %p506_p6, %p500_p5 }
 0x140   : > { %510 = shalt.err (!%p507_p8)
}
 0x141   : > { %368 = dma.vmem_to_hbm [thread:$0]  (%p668_p12), %s732_s22, 64, %s730_s30, %s241_s13  }
 0x142 PF: > { %s266_s19 = sand.u32 1, %s541_s9   ;;  %p791_p10 = scmp.ne.s32.totalorder %s781_s16, 0 }
 0x143   : > { %p792_p13 = scmp.ge.s32.totalorder %s553_s12, 2  ;;  %s267_s29 = scalar_lea.sflag [#allocation4], %s266_s19 }
 0x145   : > { %p379_p3 = pnand %p792_p13, %p791_p10 }
 0x147   : > { %536 = dma.done.wait (!%p379_p3), %s267_s29, 64  }
 0x148   : > { %538 = vsyncadd (!%p379_p3), %s267_s29, 4294967232  ;;  %p16_p7 = scmp.ge.s32.totalorder %s633_s21, 4   ;;  %s793_s9 = smov %s545_s10 }
 0x149   : > { %s794_s10 = smov %s549_s11  ;;  %s795_s11 = smov %s664_s8 }
 0x14a   : > { %s796_s12 = smov %s633_s21  ;;  %18 = sbr.rel (!%p16_p7) target bundleno = 6 (0x6), region = 77 }
 0x151   :  { %272 = vsyncpa [#allocation3], 1 }
 0x152   :  { %274 = vsyncpa [#allocation3 + $0x1], 1 }
 0x153   :  { %275 = vsyncpa [#allocation6], 1 }
 0x154   :  { %276 = vsyncpa [#allocation4], 1 }
 0x155   :  { %278 = vsyncpa [#allocation4 + $0x1], 1 }

</bundles_post_ra>
